<compile_context>
chip_gen: v7x
topology: tpu7x:2x2x1
jax: 0.10.0
libtpu: 0.0.40
codegen_flags: <defaults>
</compile_context>

<pallas_src>
import functools

import jax
import jax.numpy as jnp
import numpy as np
from jax.experimental import pallas as pl
from jax.experimental.pallas import tpu as pltpu

# _DTYPE_TO_QVALUE_BOUNDS
INT8_QMIN, INT8_QMAX = -128, 127
INT4_QMIN, INT4_QMAX = -8, 7
F32_EPS = float(jnp.finfo(jnp.float32).eps)

_DEFAULT_BLOCK_BYTES = 4 * 1024 * 1024   # ~4 MiB/block -> ~16 MiB double-buffered
_GROUPED_BLOCK_BYTES = 2 * 1024 * 1024   # smaller blocks for the butterfly path
_MAX_TILE_ROWS = 1024
_VMEM_LIMIT_BYTES = 48 * 1024 * 1024     # headroom under v7x's 64 MiB physical VMEM


def _round_up(x, m):
    return ((x + m - 1) // m) * m


def _choose_tile_rows(n_rows, row_len, itemsize, block_bytes):
    """Pick a row-tile: multiple of the sublane packing, sized to ~block_bytes."""
    sub = max(8, 32 // max(1, itemsize))          # 8 for f32, 16 for bf16, 32 for int8
    budget = max(sub, block_bytes // max(1, row_len * itemsize))
    tile = min(_MAX_TILE_ROWS, budget, _round_up(n_rows, sub))
    return max(sub, (tile // sub) * sub)


# ----------------------------------------------------------------------------
# In-kernel helpers
# ----------------------------------------------------------------------------
def _segment_allmax_lanes(v, gs):
    """Max all-reduce within aligned, contiguous `gs`-lane segments.

    `gs` must be a power of two dividing v.shape[-1].  Uses a hypercube
    butterfly built from pltpu.roll (XLU) + select (VPU): after log2(gs)
    steps every lane holds its segment's max.
    """
    axis = v.ndim - 1
    h = v.shape[axis]
    lane = jax.lax.broadcasted_iota(jnp.int32, v.shape, axis)
    s = 1
    while s < gs:
        up = pltpu.roll(v, shift=s, axis=axis)        # v[i - s]
        dn = pltpu.roll(v, shift=h - s, axis=axis)    # v[i + s]
        partner = jnp.where((lane & s) != 0, up, dn)  # v[i XOR s]
        v = jnp.maximum(v, partner)
        s *= 2
    return v


# ----------------------------------------------------------------------------
# Pallas kernels
# ----------------------------------------------------------------------------
def _per_token_asym_kernel(x_ref, o_ref, *, qmin, qmax, eps):
    """choose_qparams_affine(ASYMMETRIC, per-token) + fake_quantize, fused."""
    x = x_ref[...].astype(jnp.float32)
    min_neg = jnp.minimum(jnp.min(x, axis=-1, keepdims=True), 0.0)
    max_pos = jnp.maximum(jnp.max(x, axis=-1, keepdims=True), 0.0)
    scale = jnp.maximum((max_pos - min_neg) / float(qmax - qmin), eps)
    inv_scale = pl.reciprocal(scale, approx=False)
    zp = jnp.clip(float(qmin) - jnp.round(min_neg * inv_scale),
                  float(qmin), float(qmax))
    q = jnp.clip(jnp.round(x * inv_scale) + zp, float(qmin), float(qmax))
    o_ref[...] = ((q - zp) * scale).astype(o_ref.dtype)


def _per_group_sym_kernel(x_ref, o_ref, *, group_size, qmin, qmax, eps):
    """get_group_qparams_symmetric + fake_quantize_per_channel_group, fused.

    The block stays lane-dense (rows x hidden); the per-group max|x| is
    computed in-kernel (butterfly) when group_size < hidden.
    """
    x = x_ref[...].astype(jnp.float32)
    absx = jnp.abs(x)
    if group_size == x.shape[-1]:
        max_abs = jnp.max(absx, axis=-1, keepdims=True)
    else:
        max_abs = _segment_allmax_lanes(absx, group_size)
    scale = jnp.maximum(max_abs / (float(qmax - qmin) / 2.0), eps)
    inv_scale = pl.reciprocal(scale, approx=False)
    # symmetric => zero_point == 0
    q = jnp.clip(jnp.round(x * inv_scale), float(qmin), float(qmax))
    o_ref[...] = (q * scale).astype(o_ref.dtype)


def _rowwise_pallas_call(x2d, kernel_fn, *, block_bytes=_DEFAULT_BLOCK_BYTES):
    """Run a row-wise fake-quant kernel over a (num_rows, row_len) array."""
    n, d = x2d.shape
    itemsize = x2d.dtype.itemsize
    tile = _choose_tile_rows(n, d, itemsize, block_bytes)
    nbytes = x2d.size * itemsize
    cost = pl.CostEstimate(flops=10 * x2d.size, transcendentals=0,
                           bytes_accessed=2 * nbytes)
    return pl.pallas_call(
        kernel_fn,
        out_shape=jax.ShapeDtypeStruct((n, d), x2d.dtype),
        grid_spec=pltpu.PrefetchScalarGridSpec(
            num_scalar_prefetch=0,
            grid=(pl.cdiv(n, tile),),
            in_specs=[pl.BlockSpec((tile, d), lambda i: (i, 0))],
            out_specs=pl.BlockSpec((tile, d), lambda i: (i, 0)),
        ),
        compiler_params=pltpu.CompilerParams(
            dimension_semantics=("parallel",),
            vmem_limit_bytes=_VMEM_LIMIT_BYTES),
        cost_estimate=cost,
    )(x2d)


# ----------------------------------------------------------------------------
# Module-level wrapper (mirrors FakeQuantizer / FakeQuantizeConfig)
# ----------------------------------------------------------------------------
class FakeQuantizeConfig:
    def __init__(self, dtype, granularity, group_size=None,
                 is_symmetric=None, is_dynamic=True, eps=None):
        assert dtype in ("int8", "int4")
        assert granularity in ("per_token", "per_group", "per_axis")
        self.dtype = dtype
        self.granularity = granularity
        self.group_size = group_size
        self.is_symmetric = is_symmetric
        self.is_dynamic = is_dynamic
        self.eps = F32_EPS if eps is None else float(eps)
        self.range_learning = False


class FakeQuantizer:
    """JAX/Pallas port of torchao.quantization.qat.FakeQuantizer forward()."""

    def __init__(self, config: FakeQuantizeConfig):
        self.config = config
        self.enabled = True
        # TODO(synk): static (is_dynamic=False) / range-learning paths reuse
        # persisted scale/zero_point nn.Parameters; here qparams are always
        # recomputed dynamically inside the kernel (the is_dynamic=True path).

    def __call__(self, x):
        if not self.enabled:
            return x
        if self.config.granularity == "per_token":
            return self._per_token_forward(x)
        return self._per_channel_or_group_forward(x)

    def _per_token_forward(self, x):
        if self.config.is_symmetric:
            raise NotImplementedError("Symmetric per token is not supported yet")
        qmin, qmax = (INT8_QMIN, INT8_QMAX) if self.config.dtype == "int8" \
            else (INT4_QMIN, INT4_QMAX)
        d = x.shape[-1]
        x2d = x.reshape(-1, d)
        kern = functools.partial(_per_token_asym_kernel,
                                 qmin=qmin, qmax=qmax, eps=self.config.eps)
        return _rowwise_pallas_call(x2d, kern).reshape(x.shape)

    def _per_channel_or_group_forward(self, x):
        # TODO(synk): asymmetric per-group (get_groupwise_affine_qparams) path
        # is not implemented; only the symmetric weight path is covered.
        assert self.config.is_symmetric, "only the symmetric weight path is implemented"
        qmin, qmax = (INT4_QMIN, INT4_QMAX) if self.config.dtype == "int4" \
            else (INT8_QMIN, INT8_QMAX)
        last = x.shape[-1]
        if self.config.granularity == "per_axis":
            # PerAxis(axis=0) expressed as per-group with group = last dim.
            group_size = last
        else:
            group_size = self.config.group_size
        assert last % group_size == 0

        if group_size == last or (group_size & (group_size - 1)) != 0:
            # Whole row is one group (per-axis), or non-power-of-two group:
            # fall back to one-group-per-row layout (full-row reduction).
            x2d = x.reshape(-1, group_size)
            block_bytes = _DEFAULT_BLOCK_BYTES
        else:
            # Lane-dense layout: keep the full hidden dim on the lane axis and
            # do the grouped reduction inside the kernel.
            x2d = x.reshape(-1, last)
            block_bytes = _GROUPED_BLOCK_BYTES
        kern = functools.partial(_per_group_sym_kernel, group_size=group_size,
                                 qmin=qmin, qmax=qmax, eps=self.config.eps)
        return _rowwise_pallas_call(x2d, kern,
                                    block_bytes=block_bytes).reshape(x.shape)


# ----------------------------------------------------------------------------
# Pure-JAX references (for correctness check only; mirror the kernel math)
# ----------------------------------------------------------------------------
def _ref_per_token_asym(x, qmin, qmax, eps):
    d = x.shape[-1]
    xf = x.reshape(-1, d).astype(jnp.float32)
    mn = jnp.minimum(jnp.min(xf, -1, keepdims=True), 0.0)
    mx = jnp.maximum(jnp.max(xf, -1, keepdims=True), 0.0)
    scale = jnp.maximum((mx - mn) / float(qmax - qmin), eps)
    inv = 1.0 / scale
    zp = jnp.clip(float(qmin) - jnp.round(mn * inv), qmin, qmax)
    q = jnp.clip(jnp.round(xf * inv) + zp, qmin, qmax)
    return ((q - zp) * scale).reshape(x.shape).astype(x.dtype)


def _ref_per_group_sym(x, group_size, qmin, qmax, eps):
    xf = x.reshape(-1, group_size).astype(jnp.float32)
    max_abs = jnp.max(jnp.abs(xf), -1, keepdims=True)
    scale = jnp.maximum(max_abs / (float(qmax - qmin) / 2.0), eps)
    inv = 1.0 / scale
    q = jnp.clip(jnp.round(xf * inv), qmin, qmax)
    return (q * scale).reshape(x.shape).astype(x.dtype)


if __name__ == "__main__":
    key = jax.random.PRNGKey(0)
    k_act, k_w1, k_w2 = jax.random.split(key, 3)

    # 1) Activation path: per-token asymmetric int8; x: (batch=2, seq=8, hidden=128)
    x = jax.random.normal(k_act, (2, 8, 128), dtype=jnp.float32) * 3.0 + 0.5
    act_fq = FakeQuantizer(FakeQuantizeConfig(
        "int8", "per_token", is_symmetric=False, is_dynamic=True))
    y_act = jax.block_until_ready(act_fq(x))
    np.testing.assert_allclose(
        np.asarray(y_act),
        np.asarray(_ref_per_token_asym(x, INT8_QMIN, INT8_QMAX, F32_EPS)),
        rtol=1e-5, atol=1e-5)

    # 2) Weight path: per-group symmetric int4, group_size=32 (lane-dense block,
    #    in-kernel grouped reduction); w: (out=8, in=256)
    w = jax.random.normal(k_w1, (8, 256), dtype=jnp.float32)
    wt_fq = FakeQuantizer(FakeQuantizeConfig(
        "int4", "per_group", group_size=32, is_symmetric=True, is_dynamic=True))
    y_w = jax.block_until_ready(wt_fq(w))
    np.testing.assert_allclose(
        np.asarray(y_w),
        np.asarray(_ref_per_group_sym(w, 32, INT4_QMIN, INT4_QMAX, F32_EPS)),
        rtol=1e-5, atol=1e-5)

    # 3) Weight path: per-axis(0) symmetric int4 (group = whole row); w2: (8, 128)
    w2 = jax.random.normal(k_w2, (8, 128), dtype=jnp.float32)
    ax_fq = FakeQuantizer(FakeQuantizeConfig(
        "int4", "per_axis", is_symmetric=True, is_dynamic=True))
    y_w2 = jax.block_until_ready(ax_fq(w2))
    np.testing.assert_allclose(
        np.asarray(y_w2),
        np.asarray(_ref_per_group_sym(w2, 128, INT4_QMIN, INT4_QMAX, F32_EPS)),
        rtol=1e-5, atol=1e-5)

    print("KERNEL_OK")
</pallas_src>

<mosaic_0001>
module attributes {stable_mosaic.version = 11 : i64} {
  func.func @_per_token_asym_kernel(%arg0: i32, %arg1: memref<16x128xf32, #tpu.memory_space<vmem>>, %arg2: memref<16x128xf32, #tpu.memory_space<vmem>>) attributes {dimension_semantics = [#tpu.dimension_semantics<parallel>], iteration_bounds = array<i64: 1>, scalar_prefetch = 0 : i64, scratch_operands = 0 : i64, tpu.core_type = #tpu.core_type<tc>, window_params = [{transform_indices = @transform_0, window_bounds = array<i64: 16, 128>}, {transform_indices = @transform_1, window_bounds = array<i64: 16, 128>}]} {
    %c0 = arith.constant 0 : index
    %c0_0 = arith.constant 0 : index
    %0 = vector.load %arg1[%c0, %c0_0] : memref<16x128xf32, #tpu.memory_space<vmem>>, vector<16x128xf32>
    %cst = arith.constant dense<0x7F800000> : vector<16xf32>
    %1 = vector.multi_reduction <minimumf>, %0, %cst [1] : vector<16x128xf32> to vector<16xf32>
    %2 = vector.shape_cast %1 : vector<16xf32> to vector<16x1xf32>
    %cst_1 = arith.constant 0.000000e+00 : f32
    %3 = vector.broadcast %cst_1 : f32 to vector<16x1xf32>
    %4 = arith.minimumf %2, %3 : vector<16x1xf32>
    %cst_2 = arith.constant dense<0xFF800000> : vector<16xf32>
    %5 = vector.multi_reduction <maximumf>, %0, %cst_2 [1] : vector<16x128xf32> to vector<16xf32>
    %6 = vector.shape_cast %5 : vector<16xf32> to vector<16x1xf32>
    %cst_3 = arith.constant 0.000000e+00 : f32
    %7 = vector.broadcast %cst_3 : f32 to vector<16x1xf32>
    %8 = arith.maximumf %6, %7 : vector<16x1xf32>
    %9 = arith.subf %8, %4 : vector<16x1xf32>
    %cst_4 = arith.constant 2.550000e+02 : f32
    %10 = vector.broadcast %cst_4 : f32 to vector<16x1xf32>
    %11 = arith.divf %9, %10 : vector<16x1xf32>
    %cst_5 = arith.constant 1.1920929E-7 : f32
    %12 = vector.broadcast %cst_5 : f32 to vector<16x1xf32>
    %13 = arith.maximumf %11, %12 : vector<16x1xf32>
    %14 = tpu.reciprocal %13 : vector<16x1xf32> -> vector<16x1xf32>
    %15 = arith.mulf %4, %14 : vector<16x1xf32>
    %16 = math.roundeven %15 : vector<16x1xf32>
    %cst_6 = arith.constant -1.280000e+02 : f32
    %17 = vector.broadcast %cst_6 : f32 to vector<16x1xf32>
    %18 = arith.subf %17, %16 : vector<16x1xf32>
    %cst_7 = arith.constant -1.280000e+02 : f32
    %cst_8 = arith.constant 1.270000e+02 : f32
    %19 = vector.broadcast %cst_7 : f32 to vector<16x1xf32>
    %20 = arith.maximumf %19, %18 : vector<16x1xf32>
    %21 = vector.broadcast %cst_8 : f32 to vector<16x1xf32>
    %22 = arith.minimumf %21, %20 : vector<16x1xf32>
    %23 = vector.broadcast %14 : vector<16x1xf32> to vector<16x128xf32>
    %24 = arith.mulf %0, %23 : vector<16x128xf32>
    %25 = math.roundeven %24 : vector<16x128xf32>
    %26 = vector.broadcast %22 : vector<16x1xf32> to vector<16x128xf32>
    %27 = arith.addf %25, %26 : vector<16x128xf32>
    %cst_9 = arith.constant -1.280000e+02 : f32
    %cst_10 = arith.constant 1.270000e+02 : f32
    %28 = vector.broadcast %cst_9 : f32 to vector<16x128xf32>
    %29 = arith.maximumf %28, %27 : vector<16x128xf32>
    %30 = vector.broadcast %cst_10 : f32 to vector<16x128xf32>
    %31 = arith.minimumf %30, %29 : vector<16x128xf32>
    %32 = vector.broadcast %22 : vector<16x1xf32> to vector<16x128xf32>
    %33 = arith.subf %31, %32 : vector<16x128xf32>
    %34 = vector.broadcast %13 : vector<16x1xf32> to vector<16x128xf32>
    %35 = arith.mulf %33, %34 : vector<16x128xf32>
    %c0_11 = arith.constant 0 : index
    %c0_12 = arith.constant 0 : index
    %36 = vector.load %arg2[%c0_11, %c0_12] : memref<16x128xf32, #tpu.memory_space<vmem>>, vector<16x128xf32>
    tpu.vector_store %arg2[%c0_11, %c0_12], %35 {strides = array<i32>} : memref<16x128xf32, #tpu.memory_space<vmem>>, vector<16x128xf32>,
    return
  }
  func.func @transform_0(%arg0: i32) -> (i32, i32) {
    %c0_i32 = arith.constant 0 : i32
    %c0_i32_0 = arith.constant 0 : i32
    return %arg0, %c0_i32 : i32, i32
  }
  func.func @transform_1(%arg0: i32) -> (i32, i32) {
    %c0_i32 = arith.constant 0 : i32
    %c0_i32_0 = arith.constant 0 : i32
    return %arg0, %c0_i32 : i32, i32
  }
}

</mosaic_0001>

<bundles_post_ra>
// kernel: tpu_custom_call.1
= control target key start
LH: loop header
LB: loop body
LE: loop exit
PB: predicated region body
PF: predicated region fallthrough
CT: control target
= control target key end

     0   :  { %6 = vsyncpa [#allocation3], 0  ;;  %s193_s0 = inlined_call_operand.hbm [shape: f32[16,128], index: 0, kind: input, shape index: {}]   ;;  %s194_s1 = inlined_call_operand.hbm [shape: f32[16,128], index: 1, kind: output, shape index: {}]  }
   0x1   :  { %7 = vsyncpa [#allocation4], 0  ;;  %s149_s6 = smov [#allocation2]   ;;  %s101_s10 = scalar_lea.hbm %s193_s0, 256 }
   0x2   :  { %s13_s7 = sshll.u32 %s149_s6, 4  ;;  %p102_p0 = scmp.ne.s32.totalorder %s193_s0, %s101_s10  ;;  %s14_s7 = int_to_ptr.vmem [resolvable:$true] %s13_s7 }
   0x3   :  { %p105_p1 = scmp.lt.u32.totalorder %s101_s10, %s193_s0 }
   0x5   :  { %p107_p2 = pnand %p105_p1, %p102_p0 }
   0x7   :  { %110 = shalt.err (!%p107_p2)
}
   0x8   :  { %s111_s15 = scalar_lea.vmem %s14_s7, 256  ;;  %p116_p4 = scmp.lt.s32.totalorder %s14_s7, %s14_s7 }
   0x9   :  { %p112_p3 = scmp.ne.s32.totalorder %s14_s7, %s111_s15  ;;  %p117_p5 = scmp.lt.s32.totalorder %s111_s15, %s111_s15 }
   0xb   :  { %p118_p6 = por %p117_p5, %p116_p4 }
   0xd   :  { %p119_p7 = pnand %p118_p6, %p112_p3 }
   0xf   :  { %122 = shalt.err (!%p119_p7)
}
  0x10   :  { %s150_s16 = smov 128   ;;  %s151_s17 = smov 8  }
  0x11   :  { %19 = dma.hbm_to_vmem [thread:$0]  %s193_s0, 256, %s14_s7, [#allocation3], %s150_s16, %s150_s16, %s151_s17  }
  0x12   :  { %145 = dma.done.wait [#allocation3], 256  }
  0x13   :  { %146 = vsyncadd [#allocation3], 4294967040  ;;  %v23_v0 = vld [vmem:[#allocation2] sm:$0xff]  ;;  %v24_v1 = vld [vmem:[#allocation2 + $0x8] sm:$0xff]  ;;  %s152_s0 = smov [#allocation5]  }
  0x14   :  { %31 = vmax.xlane.f32.xlu1 %v23_v0  ;;  %25 = vmin.xlane.f32.xlu0 %v23_v0  ;;  %s77_s20 = sshll.u32 %s152_s0, 4  ;;  %s78_s20 = int_to_ptr.vmem [resolvable:$true] %s77_s20 }
  0x15   :  { %s123_s21 = scalar_lea.vmem %s78_s20, 256  ;;  %p128_p9 = scmp.lt.s32.totalorder %s78_s20, %s78_s20 }
  0x16   :  { %p124_p8 = scmp.ne.s32.totalorder %s78_s20, %s123_s21  ;;  %p129_p10 = scmp.lt.s32.totalorder %s123_s21, %s123_s21 }
  0x18   :  { %33 = vmax.xlane.f32.xlu1 %v24_v1  ;;  %27 = vmin.xlane.f32.xlu0 %v24_v1  ;;  %p130_p11 = por %p129_p10, %p128_p9 }
  0x1a   :  { %p131_p12 = pnand %p130_p11, %p124_p8 }
  0xa1   :  { %v32_v2 = vpop.xlane.xlu1 %31  ;;  %v26_v3 = vpop.xlane.xlu0 %25 }
  0xa2   :  { %v35_v4 = vmax.f32 %v32_v2, 0.0  ;;  %v29_v5 = vmin.f32 %v26_v3, 0.0 }
  0xa4   :  { %v37_v6 = vsub.f32 %v35_v4, %v29_v5 }
  0xa5   :  { %v34_v7 = vpop.xlane.xlu1 %33  ;;  %v28_v8 = vpop.xlane.xlu0 %27 }
  0xa6   :  { %v40_v9 = vmul.f32 0.003921569, %v37_v6  ;;  %v36_v10 = vmax.f32 %v34_v7, 0.0  ;;  %v30_v11 = vmin.f32 %v28_v8, 0.0 }
  0xa8   :  { %v42_v12 = vmax.f32 %v40_v9, 1.1920929e-07  ;;  %v38_v13 = vsub.f32 %v36_v10, %v30_v11 }
  0xaa   :  { %97 = vrcp.f32 %v42_v12  ;;  %v41_v14 = vmul.f32 0.003921569, %v38_v13 }
  0xac   :  { %v43_v15 = vmax.f32 %v41_v14, 1.1920929e-07 }
  0xae   :  { %99 = vrcp.f32 %v43_v15 }
  0xb4   :  { %v98_v16 = vpop.eup %97 }
  0xb5   :  { %v46_v17 = vmul.f32 %v98_v16, %v29_v5  ;;  %v56_v21 = vmul.f32 %v98_v16, %v23_v0 }
  0xb7   :  { %v89_v18 = vround.rtne.f32 %v46_v17  ;;  %v91_v26 = vround.rtne.f32 %v56_v21 }
  0xb8   :  { %v100_v19 = vpop.eup %99 }
  0xb9   :  { %v50_v20 = vsub.f32 -128.0, %v89_v18  ;;  %v47_v22 = vmul.f32 %v100_v19, %v30_v11  ;;  %v57_v28 = vmul.f32 %v100_v19, %v24_v1 }
  0xbb   :  { %v52_v23 = vmax.f32 %v50_v20, -128.0  ;;  %v90_v24 = vround.rtne.f32 %v47_v22  ;;  %v92_v33 = vround.rtne.f32 %v57_v28 }
  0xbd   :  { %v54_v25 = vmin.f32 %v52_v23, 127.0  ;;  %v51_v27 = vsub.f32 -128.0, %v90_v24 }
  0xbf   :  { %v60_v29 = vadd.f32 %v91_v26, %v54_v25  ;;  %v53_v30 = vmax.f32 %v51_v27, -128.0 }
  0xc1   :  { %v62_v31 = vmax.f32 %v60_v29, -128.0  ;;  %v55_v32 = vmin.f32 %v53_v30, 127.0 }
  0xc3   :  { %v64_v34 = vmin.f32 %v62_v31, 127.0  ;;  %v61_v35 = vadd.f32 %v92_v33, %v55_v32 }
  0xc5   :  { %v66_v36 = vsub.f32 %v64_v34, %v54_v25  ;;  %v63_v37 = vmax.f32 %v61_v35, -128.0 }
  0xc7   :  { %v65_v38 = vmin.f32 %v63_v37, 127.0  ;;  %v68_v39 = vmul.f32 %v66_v36, %v42_v12 }
  0xc9   :  { %v67_v40 = vsub.f32 %v65_v38, %v55_v32  ;;  %70 = vst [vmem:[#allocation5] sm:$0xff] %v68_v39 }
  0xcb   :  { %v69_v41 = vmul.f32 %v67_v40, %v43_v15 }
  0xcd   :  { %71 = vst [vmem:[#allocation5 + $0x8] sm:$0xff] %v69_v41 }
  0xce   :  { %134 = shalt.err (!%p131_p12)
}
  0xcf   :  { %s135_s24 = scalar_lea.hbm %s194_s1, 256 }
  0xd0   :  { %p136_p13 = scmp.ne.s32.totalorder %s194_s1, %s135_s24  ;;  %p139_p0 = scmp.lt.u32.totalorder %s135_s24, %s194_s1 }
  0xd2   :  { %p141_p1 = pnand %p139_p0, %p136_p13 }
  0xd4   :  { %144 = shalt.err (!%p141_p1)
}
  0xd5   :  { %83 = dma.vmem_to_hbm [thread:$0]  %s78_s20, 256, %s194_s1, [#allocation4], %s150_s16, %s150_s16, %s151_s17  }
  0xd6   :  { %147 = dma.done.wait [#allocation4], 256  }
  0xd7   :  { %148 = vsyncadd [#allocation4], 4294967040 }
  0xd8   :  { %87 = vsyncpa [#allocation3], 1 }
  0xd9   :  { %88 = vsyncpa [#allocation4], 1 }

</bundles_post_ra>
